<compile_context>
chip_gen: v7x
topology: tpu7x:2x2x1
jax: 0.10.0
libtpu: 0.0.40
codegen_flags: <defaults>
</compile_context>

<pallas_src>
import functools

import jax
import jax.numpy as jnp
from jax.experimental import pallas as pl
from jax.experimental.pallas import tpu as pltpu

blockSiz = 8     # max sequence length (causal mask size)
nEmb = 32        # embedding dim C
numHead = 4      # number of heads
headSiz = 8      # per-head dim D  (numHead * headSiz == nEmb)


def _mha_kernel(x_ref, wqkv_ref, out_ref, *, num_heads, head_dim):
    # x_ref:    (B, T, C)        full block
    # wqkv_ref: (C, 3*H*D)       fused [Q | K | V] projection weight (Q pre-scaled)
    # out_ref:  (B, T, H*D)      lane-dense, head-concatenated output
    x = x_ref[...].astype(jnp.float32)
    B, T, C = x.shape
    H, D = num_heads, head_dim
    HD = H * D

    # One fused projection matmul for all heads' Q, K and V.
    qkv = jnp.dot(x.reshape(B * T, C), wqkv_ref[...].astype(jnp.float32),
                  preferred_element_type=jnp.float32)            # (B*T, 3*H*D)

    # Causal mask, built once (single grid step, shared by all heads).
    row = jax.lax.broadcasted_iota(jnp.int32, (T, T), 0)
    col = jax.lax.broadcasted_iota(jnp.int32, (T, T), 1)
    causal = (row >= col)[None, :, :]                            # (1, T, T)

    outs = []
    for h in range(H):  # static Python loop, fully unrolled (H is tiny)
        q = qkv[:, h * D:(h + 1) * D].reshape(B, T, D)
        k = qkv[:, HD + h * D:HD + (h + 1) * D].reshape(B, T, D)
        v = qkv[:, 2 * HD + h * D:2 * HD + (h + 1) * D].reshape(B, T, D)

        # C**-0.5 scale is already folded into the Q weight block.
        s = jnp.einsum('btd,bsd->bts', q, k,
                       preferred_element_type=jnp.float32)       # (B, T, T)
        s = jnp.where(causal, s, -jnp.inf)

        m = jnp.max(s, axis=-1, keepdims=True)
        p = jnp.exp(s - m)
        denom = jnp.sum(p, axis=-1, keepdims=True)
        attn = p * pl.reciprocal(denom, approx=True)

        outs.append(jnp.einsum('bts,bsd->btd', attn, v,
                               preferred_element_type=jnp.float32))

    # Single full-width (lane-dense) store, matching torch.cat([...], dim=-1).
    out_ref[...] = jnp.concatenate(outs, axis=-1).astype(out_ref.dtype)


def multi_head_attention(x, wq, wk, wv):
    """x: (B, T, C) float32; wq/wk/wv: (H, C, D). Returns (B, T, H*D)."""
    B, T, C = x.shape
    H, _, D = wq.shape
    scale = C ** (-0.5)   # NOTE: PyTorch module scales by C**-0.5 (C = nEmb)

    # Build the fused projection weight (C, 3*H*D):
    #   columns [0, H*D)      -> per-head Q weights (scale folded in)
    #   columns [H*D, 2*H*D)  -> per-head K weights
    #   columns [2*H*D, 3*H*D)-> per-head V weights
    wq_f = jnp.transpose(wq, (1, 0, 2)).reshape(C, H * D) * scale
    wk_f = jnp.transpose(wk, (1, 0, 2)).reshape(C, H * D)
    wv_f = jnp.transpose(wv, (1, 0, 2)).reshape(C, H * D)
    wqkv = jnp.concatenate([wq_f, wk_f, wv_f], axis=-1)          # (C, 3*H*D)

    kernel = functools.partial(_mha_kernel, num_heads=H, head_dim=D)

    return pl.pallas_call(
        kernel,
        out_shape=jax.ShapeDtypeStruct((B, T, H * D), x.dtype),
        grid_spec=pltpu.PrefetchScalarGridSpec(
            num_scalar_prefetch=0,
            grid=(1,),                                           # single step
            in_specs=[
                pl.BlockSpec((B, T, C), lambda i: (0, 0, 0)),        # x, resident
                pl.BlockSpec((C, 3 * H * D), lambda i: (0, 0)),      # fused W, resident
            ],
            out_specs=pl.BlockSpec((B, T, H * D), lambda i: (0, 0, 0)),
        ),
        compiler_params=pltpu.CompilerParams(
            dimension_semantics=("arbitrary",)),
    )(x, wqkv)


def _reference(x, wq, wk, wv):
    """Pure-JAX reference mirroring the PyTorch forward."""
    B, T, C = x.shape
    outs = []
    tril = jnp.tril(jnp.ones((T, T), dtype=bool))
    for h in range(wq.shape[0]):
        q = x @ wq[h]
        k = x @ wk[h]
        v = x @ wv[h]
        w = (q @ jnp.swapaxes(k, -2, -1)) * (C ** -0.5)
        w = jnp.where(tril[None], w, -jnp.inf)
        w = jax.nn.softmax(w, axis=-1)
        outs.append(w @ v)
    return jnp.concatenate(outs, axis=-1)


if __name__ == "__main__":
    key = jax.random.PRNGKey(0)
    kx, kq, kk, kv = jax.random.split(key, 4)

    B, T, C, H, D = 2, blockSiz, nEmb, numHead, headSiz

    # Deterministic synthetic parameters (nn.Linear-style uniform init,
    # stored pre-transposed as (H, C, D)).
    bound = 1.0 / (C ** 0.5)
    wq = jax.random.uniform(kq, (H, C, D), jnp.float32, -bound, bound)
    wk = jax.random.uniform(kk, (H, C, D), jnp.float32, -bound, bound)
    wv = jax.random.uniform(kv, (H, C, D), jnp.float32, -bound, bound)

    x = jax.random.normal(kx, (B, T, C), jnp.float32)

    out = multi_head_attention(x, wq, wk, wv)
    out = jax.block_until_ready(out)

    ref = _reference(x, wq, wk, wv)
    assert out.shape == (B, T, H * D)
    # Slightly relaxed tolerance: softmax denominator uses EUP approx reciprocal.
    assert jnp.allclose(out, ref, atol=3e-3, rtol=3e-3)

    print("KERNEL_OK")
</pallas_src>

<mosaic_0001>
module attributes {stable_mosaic.version = 11 : i64} {
  func.func @_mha_kernel(%arg0: i32, %arg1: memref<2x8x32xf32, #tpu.memory_space<vmem>>, %arg2: memref<32x96xf32, #tpu.memory_space<vmem>>, %arg3: memref<2x8x32xf32, #tpu.memory_space<vmem>>) attributes {dimension_semantics = [#tpu.dimension_semantics<arbitrary>], iteration_bounds = array<i64: 1>, scalar_prefetch = 0 : i64, scratch_operands = 0 : i64, tpu.core_type = #tpu.core_type<tc>, window_params = [{pipeline_mode = #tpu.pipeline_mode<synchronous>, transform_indices = @transform_0, window_bounds = array<i64: 2, 8, 32>}, {pipeline_mode = #tpu.pipeline_mode<synchronous>, transform_indices = @transform_1, window_bounds = array<i64: 32, 96>}, {pipeline_mode = #tpu.pipeline_mode<synchronous>, transform_indices = @transform_2, window_bounds = array<i64: 2, 8, 32>}]} {
    %c0 = arith.constant 0 : index
    %c0_0 = arith.constant 0 : index
    %c0_1 = arith.constant 0 : index
    %0 = vector.load %arg1[%c0, %c0_0, %c0_1] : memref<2x8x32xf32, #tpu.memory_space<vmem>>, vector<2x8x32xf32>
    %1 = vector.shape_cast %0 : vector<2x8x32xf32> to vector<16x32xf32>
    %c0_2 = arith.constant 0 : index
    %c0_3 = arith.constant 0 : index
    %2 = vector.load %arg2[%c0_2, %c0_3] : memref<32x96xf32, #tpu.memory_space<vmem>>, vector<32x96xf32>
    %cst = arith.constant dense<0.000000e+00> : vector<16x96xf32>
    %3 = tpu.matmul %1, %2, %cst {dimension_numbers = #tpu.dot_dimension_numbers<[1], [0], [0], [1], [0, 0, 1, 1], [], []>} : vector<16x32xf32>, vector<32x96xf32>, vector<16x96xf32> -> vector<16x96xf32>
    %4 = tpu.iota {dimensions = array<i32: 0>} : vector<8x8xi32>
    %5 = tpu.iota {dimensions = array<i32: 1>} : vector<8x8xi32>
    %6 = arith.cmpi sge, %4, %5 : vector<8x8xi32>
    %7 = vector.shape_cast %6 : vector<8x8xi1> to vector<1x8x8xi1>
    %8 = vector.extract_strided_slice %3 {offsets = [0, 0], sizes = [16, 8], strides = [1, 1]} : vector<16x96xf32> to vector<16x8xf32>
    %9 = vector.shape_cast %8 : vector<16x8xf32> to vector<2x8x8xf32>
    %10 = vector.extract_strided_slice %3 {offsets = [0, 32], sizes = [16, 8], strides = [1, 1]} : vector<16x96xf32> to vector<16x8xf32>
    %11 = vector.shape_cast %10 : vector<16x8xf32> to vector<2x8x8xf32>
    %12 = vector.extract_strided_slice %3 {offsets = [0, 64], sizes = [16, 8], strides = [1, 1]} : vector<16x96xf32> to vector<16x8xf32>
    %13 = vector.shape_cast %12 : vector<16x8xf32> to vector<2x8x8xf32>
    "tpu.trace_start"() <{level = 10 : i32, message = "btd,bsd->bts"}> : () -> ()
    %cst_4 = arith.constant dense<0.000000e+00> : vector<2x8x8xf32>
    %14 = tpu.matmul %9, %11, %cst_4 {dimension_numbers = #tpu.dot_dimension_numbers<[2], [2], [1], [1], [0, 0, 0, 1, 1, 1], [0], [0]>} : vector<2x8x8xf32>, vector<2x8x8xf32>, vector<2x8x8xf32> -> vector<2x8x8xf32>
    %cst_5 = arith.constant 0xFF800000 : f32
    "tpu.trace_stop"() : () -> ()
    %15 = vector.shape_cast %7 : vector<1x8x8xi1> to vector<1x8x8xi1>
    %16 = vector.broadcast %15 : vector<1x8x8xi1> to vector<2x8x8xi1>
    %17 = vector.broadcast %cst_5 : f32 to vector<2x8x8xf32>
    %18 = arith.select %16, %14, %17 : vector<2x8x8xi1>, vector<2x8x8xf32>
    %cst_6 = arith.constant dense<0xFF800000> : vector<2x8xf32>
    %19 = vector.multi_reduction <maximumf>, %18, %cst_6 [2] : vector<2x8x8xf32> to vector<2x8xf32>
    %20 = vector.shape_cast %19 : vector<2x8xf32> to vector<2x8x1xf32>
    %21 = vector.broadcast %20 : vector<2x8x1xf32> to vector<2x8x8xf32>
    %22 = arith.subf %18, %21 : vector<2x8x8xf32>
    %23 = math.exp %22 : vector<2x8x8xf32>
    %cst_7 = arith.constant dense<0.000000e+00> : vector<2x8xf32>
    %24 = vector.multi_reduction <add>, %23, %cst_7 [2] : vector<2x8x8xf32> to vector<2x8xf32>
    %25 = vector.shape_cast %24 : vector<2x8xf32> to vector<2x8x1xf32>
    %26 = tpu.reciprocal %25 {approx = true} : vector<2x8x1xf32> -> vector<2x8x1xf32>
    %27 = vector.broadcast %26 : vector<2x8x1xf32> to vector<2x8x8xf32>
    %28 = arith.mulf %23, %27 : vector<2x8x8xf32>
    "tpu.trace_start"() <{level = 10 : i32, message = "bts,bsd->btd"}> : () -> ()
    %cst_8 = arith.constant dense<0.000000e+00> : vector<2x8x8xf32>
    %29 = tpu.matmul %28, %13, %cst_8 {dimension_numbers = #tpu.dot_dimension_numbers<[2], [1], [1], [2], [0, 0, 0, 1, 1, 2], [0], [0]>} : vector<2x8x8xf32>, vector<2x8x8xf32>, vector<2x8x8xf32> -> vector<2x8x8xf32>
    "tpu.trace_stop"() : () -> ()
    %30 = vector.extract_strided_slice %3 {offsets = [0, 8], sizes = [16, 8], strides = [1, 1]} : vector<16x96xf32> to vector<16x8xf32>
    %31 = vector.shape_cast %30 : vector<16x8xf32> to vector<2x8x8xf32>
    %32 = vector.extract_strided_slice %3 {offsets = [0, 40], sizes = [16, 8], strides = [1, 1]} : vector<16x96xf32> to vector<16x8xf32>
    %33 = vector.shape_cast %32 : vector<16x8xf32> to vector<2x8x8xf32>
    %34 = vector.extract_strided_slice %3 {offsets = [0, 72], sizes = [16, 8], strides = [1, 1]} : vector<16x96xf32> to vector<16x8xf32>
    %35 = vector.shape_cast %34 : vector<16x8xf32> to vector<2x8x8xf32>
    "tpu.trace_start"() <{level = 10 : i32, message = "btd,bsd->bts"}> : () -> ()
    %cst_9 = arith.constant dense<0.000000e+00> : vector<2x8x8xf32>
    %36 = tpu.matmul %31, %33, %cst_9 {dimension_numbers = #tpu.dot_dimension_numbers<[2], [2], [1], [1], [0, 0, 0, 1, 1, 1], [0], [0]>} : vector<2x8x8xf32>, vector<2x8x8xf32>, vector<2x8x8xf32> -> vector<2x8x8xf32>
    %cst_10 = arith.constant 0xFF800000 : f32
    "tpu.trace_stop"() : () -> ()
    %37 = vector.shape_cast %7 : vector<1x8x8xi1> to vector<1x8x8xi1>
    %38 = vector.broadcast %37 : vector<1x8x8xi1> to vector<2x8x8xi1>
    %39 = vector.broadcast %cst_10 : f32 to vector<2x8x8xf32>
    %40 = arith.select %38, %36, %39 : vector<2x8x8xi1>, vector<2x8x8xf32>
    %cst_11 = arith.constant dense<0xFF800000> : vector<2x8xf32>
    %41 = vector.multi_reduction <maximumf>, %40, %cst_11 [2] : vector<2x8x8xf32> to vector<2x8xf32>
    %42 = vector.shape_cast %41 : vector<2x8xf32> to vector<2x8x1xf32>
    %43 = vector.broadcast %42 : vector<2x8x1xf32> to vector<2x8x8xf32>
    %44 = arith.subf %40, %43 : vector<2x8x8xf32>
    %45 = math.exp %44 : vector<2x8x8xf32>
    %cst_12 = arith.constant dense<0.000000e+00> : vector<2x8xf32>
    %46 = vector.multi_reduction <add>, %45, %cst_12 [2] : vector<2x8x8xf32> to vector<2x8xf32>
    %47 = vector.shape_cast %46 : vector<2x8xf32> to vector<2x8x1xf32>
    %48 = tpu.reciprocal %47 {approx = true} : vector<2x8x1xf32> -> vector<2x8x1xf32>
    %49 = vector.broadcast %48 : vector<2x8x1xf32> to vector<2x8x8xf32>
    %50 = arith.mulf %45, %49 : vector<2x8x8xf32>
    "tpu.trace_start"() <{level = 10 : i32, message = "bts,bsd->btd"}> : () -> ()
    %cst_13 = arith.constant dense<0.000000e+00> : vector<2x8x8xf32>
    %51 = tpu.matmul %50, %35, %cst_13 {dimension_numbers = #tpu.dot_dimension_numbers<[2], [1], [1], [2], [0, 0, 0, 1, 1, 2], [0], [0]>} : vector<2x8x8xf32>, vector<2x8x8xf32>, vector<2x8x8xf32> -> vector<2x8x8xf32>
    "tpu.trace_stop"() : () -> ()
    %52 = vector.extract_strided_slice %3 {offsets = [0, 16], sizes = [16, 8], strides = [1, 1]} : vector<16x96xf32> to vector<16x8xf32>
    %53 = vector.shape_cast %52 : vector<16x8xf32> to vector<2x8x8xf32>
    %54 = vector.extract_strided_slice %3 {offsets = [0, 48], sizes = [16, 8], strides = [1, 1]} : vector<16x96xf32> to vector<16x8xf32>
    %55 = vector.shape_cast %54 : vector<16x8xf32> to vector<2x8x8xf32>
    %56 = vector.extract_strided_slice %3 {offsets = [0, 80], sizes = [16, 8], strides = [1, 1]} : vector<16x96xf32> to vector<16x8xf32>
    %57 = vector.shape_cast %56 : vector<16x8xf32> to vector<2x8x8xf32>
    "tpu.trace_start"() <{level = 10 : i32, message = "btd,bsd->bts"}> : () -> ()
    %cst_14 = arith.constant dense<0.000000e+00> : vector<2x8x8xf32>
    %58 = tpu.matmul %53, %55, %cst_14 {dimension_numbers = #tpu.dot_dimension_numbers<[2], [2], [1], [1], [0, 0, 0, 1, 1, 1], [0], [0]>} : vector<2x8x8xf32>, vector<2x8x8xf32>, vector<2x8x8xf32> -> vector<2x8x8xf32>
    %cst_15 = arith.constant 0xFF800000 : f32
    "tpu.trace_stop"() : () -> ()
    %59 = vector.shape_cast %7 : vector<1x8x8xi1> to vector<1x8x8xi1>
    %60 = vector.broadcast %59 : vector<1x8x8xi1> to vector<2x8x8xi1>
    %61 = vector.broadcast %cst_15 : f32 to vector<2x8x8xf32>
    %62 = arith.select %60, %58, %61 : vector<2x8x8xi1>, vector<2x8x8xf32>
    %cst_16 = arith.constant dense<0xFF800000> : vector<2x8xf32>
    %63 = vector.multi_reduction <maximumf>, %62, %cst_16 [2] : vector<2x8x8xf32> to vector<2x8xf32>
    %64 = vector.shape_cast %63 : vector<2x8xf32> to vector<2x8x1xf32>
    %65 = vector.broadcast %64 : vector<2x8x1xf32> to vector<2x8x8xf32>
    %66 = arith.subf %62, %65 : vector<2x8x8xf32>
    %67 = math.exp %66 : vector<2x8x8xf32>
    %cst_17 = arith.constant dense<0.000000e+00> : vector<2x8xf32>
    %68 = vector.multi_reduction <add>, %67, %cst_17 [2] : vector<2x8x8xf32> to vector<2x8xf32>
    %69 = vector.shape_cast %68 : vector<2x8xf32> to vector<2x8x1xf32>
    %70 = tpu.reciprocal %69 {approx = true} : vector<2x8x1xf32> -> vector<2x8x1xf32>
    %71 = vector.broadcast %70 : vector<2x8x1xf32> to vector<2x8x8xf32>
    %72 = arith.mulf %67, %71 : vector<2x8x8xf32>
    "tpu.trace_start"() <{level = 10 : i32, message = "bts,bsd->btd"}> : () -> ()
    %cst_18 = arith.constant dense<0.000000e+00> : vector<2x8x8xf32>
    %73 = tpu.matmul %72, %57, %cst_18 {dimension_numbers = #tpu.dot_dimension_numbers<[2], [1], [1], [2], [0, 0, 0, 1, 1, 2], [0], [0]>} : vector<2x8x8xf32>, vector<2x8x8xf32>, vector<2x8x8xf32> -> vector<2x8x8xf32>
    "tpu.trace_stop"() : () -> ()
    %74 = vector.extract_strided_slice %3 {offsets = [0, 24], sizes = [16, 8], strides = [1, 1]} : vector<16x96xf32> to vector<16x8xf32>
    %75 = vector.shape_cast %74 : vector<16x8xf32> to vector<2x8x8xf32>
    %76 = vector.extract_strided_slice %3 {offsets = [0, 56], sizes = [16, 8], strides = [1, 1]} : vector<16x96xf32> to vector<16x8xf32>
    %77 = vector.shape_cast %76 : vector<16x8xf32> to vector<2x8x8xf32>
    %78 = vector.extract_strided_slice %3 {offsets = [0, 88], sizes = [16, 8], strides = [1, 1]} : vector<16x96xf32> to vector<16x8xf32>
    %79 = vector.shape_cast %78 : vector<16x8xf32> to vector<2x8x8xf32>
    "tpu.trace_start"() <{level = 10 : i32, message = "btd,bsd->bts"}> : () -> ()
    %cst_19 = arith.constant dense<0.000000e+00> : vector<2x8x8xf32>
    %80 = tpu.matmul %75, %77, %cst_19 {dimension_numbers = #tpu.dot_dimension_numbers<[2], [2], [1], [1], [0, 0, 0, 1, 1, 1], [0], [0]>} : vector<2x8x8xf32>, vector<2x8x8xf32>, vector<2x8x8xf32> -> vector<2x8x8xf32>
    %cst_20 = arith.constant 0xFF800000 : f32
    "tpu.trace_stop"() : () -> ()
    %81 = vector.shape_cast %7 : vector<1x8x8xi1> to vector<1x8x8xi1>
    %82 = vector.broadcast %81 : vector<1x8x8xi1> to vector<2x8x8xi1>
    %83 = vector.broadcast %cst_20 : f32 to vector<2x8x8xf32>
    %84 = arith.select %82, %80, %83 : vector<2x8x8xi1>, vector<2x8x8xf32>
    %cst_21 = arith.constant dense<0xFF800000> : vector<2x8xf32>
    %85 = vector.multi_reduction <maximumf>, %84, %cst_21 [2] : vector<2x8x8xf32> to vector<2x8xf32>
    %86 = vector.shape_cast %85 : vector<2x8xf32> to vector<2x8x1xf32>
    %87 = vector.broadcast %86 : vector<2x8x1xf32> to vector<2x8x8xf32>
    %88 = arith.subf %84, %87 : vector<2x8x8xf32>
    %89 = math.exp %88 : vector<2x8x8xf32>
    %cst_22 = arith.constant dense<0.000000e+00> : vector<2x8xf32>
    %90 = vector.multi_reduction <add>, %89, %cst_22 [2] : vector<2x8x8xf32> to vector<2x8xf32>
    %91 = vector.shape_cast %90 : vector<2x8xf32> to vector<2x8x1xf32>
    %92 = tpu.reciprocal %91 {approx = true} : vector<2x8x1xf32> -> vector<2x8x1xf32>
    %93 = vector.broadcast %92 : vector<2x8x1xf32> to vector<2x8x8xf32>
    %94 = arith.mulf %89, %93 : vector<2x8x8xf32>
    "tpu.trace_start"() <{level = 10 : i32, message = "bts,bsd->btd"}> : () -> ()
    %cst_23 = arith.constant dense<0.000000e+00> : vector<2x8x8xf32>
    %95 = tpu.matmul %94, %79, %cst_23 {dimension_numbers = #tpu.dot_dimension_numbers<[2], [1], [1], [2], [0, 0, 0, 1, 1, 2], [0], [0]>} : vector<2x8x8xf32>, vector<2x8x8xf32>, vector<2x8x8xf32> -> vector<2x8x8xf32>
    "tpu.trace_stop"() : () -> ()
    %96 = tpu.concatenate %29, %51, %73, %95 in 2 : vector<2x8x8xf32>, vector<2x8x8xf32>, vector<2x8x8xf32>, vector<2x8x8xf32> -> vector<2x8x32xf32>
    %c0_24 = arith.constant 0 : index
    %c0_25 = arith.constant 0 : index
    %c0_26 = arith.constant 0 : index
    %97 = vector.load %arg3[%c0_24, %c0_25, %c0_26] : memref<2x8x32xf32, #tpu.memory_space<vmem>>, vector<2x8x32xf32>
    tpu.vector_store %arg3[%c0_24, %c0_25, %c0_26], %96 {strides = array<i32>} : memref<2x8x32xf32, #tpu.memory_space<vmem>>, vector<2x8x32xf32>,
    return
  }
  func.func @transform_0(%arg0: i32) -> (i32, i32, i32) {
    %c0_i32 = arith.constant 0 : i32
    %c0_i32_0 = arith.constant 0 : i32
    %c0_i32_1 = arith.constant 0 : i32
    %c0_i32_2 = arith.constant 0 : i32
    return %c0_i32, %c0_i32_0, %c0_i32_1 : i32, i32, i32
  }
  func.func @transform_1(%arg0: i32) -> (i32, i32) {
    %c0_i32 = arith.constant 0 : i32
    %c0_i32_0 = arith.constant 0 : i32
    %c0_i32_1 = arith.constant 0 : i32
    return %c0_i32, %c0_i32_0 : i32, i32
  }
  func.func @transform_2(%arg0: i32) -> (i32, i32, i32) {
    %c0_i32 = arith.constant 0 : i32
    %c0_i32_0 = arith.constant 0 : i32
    %c0_i32_1 = arith.constant 0 : i32
    %c0_i32_2 = arith.constant 0 : i32
    return %c0_i32, %c0_i32_0, %c0_i32_1 : i32, i32, i32
  }
}

</mosaic_0001>

<bundles_post_ra>
// kernel: tpu_custom_call.1
= control target key start
LH: loop header
LB: loop body
LE: loop exit
PB: predicated region body
PF: predicated region fallthrough
CT: control target
= control target key end

     0   :  { %7 = vsyncpa [#allocation3], 0  ;;  %s2037_s0 = inlined_call_operand.hbm [shape: f32[2,8,32], index: 0, kind: input, shape index: {}]   ;;  %s2038_s1 = inlined_call_operand.hbm [shape: f32[32,96], index: 1, kind: input, shape index: {}]   ;;  %s2039_s2 = inlined_call_operand.hbm [shape: f32[2,8,32], index: 2, kind: output, shape index: {}]  }
   0x1   :  { %8 = vsyncpa [#allocation6], 0 }
   0x2   :  { %9 = vsyncpa [#allocation4], 0  ;;  %s1801_s9 = smov [#allocation2]   ;;  %s1729_s13 = scalar_lea.hbm %s2037_s0, 256 }
   0x3   :  { %s15_s10 = sshll.u32 %s1801_s9, 4  ;;  %p1730_p0 = scmp.ne.s32.totalorder %s2037_s0, %s1729_s13  ;;  %s16_s10 = int_to_ptr.vmem [resolvable:$true] %s15_s10 }
   0x4   :  { %p1733_p1 = scmp.lt.u32.totalorder %s1729_s13, %s2037_s0 }
   0x6   :  { %p1735_p2 = pnand %p1733_p1, %p1730_p0 }
   0x8   :  { %1738 = shalt.err (!%p1735_p2)
}
   0x9   :  { %s1739_s18 = scalar_lea.vmem %s16_s10, 256  ;;  %p1744_p4 = scmp.lt.s32.totalorder %s16_s10, %s16_s10 }
   0xa   :  { %p1740_p3 = scmp.ne.s32.totalorder %s16_s10, %s1739_s18  ;;  %p1745_p5 = scmp.lt.s32.totalorder %s1739_s18, %s1739_s18 }
   0xc   :  { %p1746_p6 = por %p1745_p5, %p1744_p4 }
   0xe   :  { %p1747_p7 = pnand %p1746_p6, %p1740_p3 }
  0x10   :  { %1750 = shalt.err (!%p1747_p7)
}
  0x11   :  { %s1802_s19 = smov 128   ;;  %s1803_s20 = smov 8  }
  0x12   :  { %21 = dma.hbm_to_vmem [thread:$0]  %s2037_s0, 256, %s16_s10, [#allocation3], %s1802_s19, %s1802_s19, %s1803_s20  }
  0x13   :  { %s1804_s23 = smov [#allocation5]   ;;  %s1751_s27 = scalar_lea.hbm %s2038_s1, 512 }
  0x14   :  { %s27_s24 = sshll.u32 %s1804_s23, 4  ;;  %p1752_p8 = scmp.ne.s32.totalorder %s2038_s1, %s1751_s27  ;;  %s28_s24 = int_to_ptr.vmem [resolvable:$true] %s27_s24 }
  0x15   :  { %p1755_p9 = scmp.lt.u32.totalorder %s1751_s27, %s2038_s1 }
  0x17   :  { %p1757_p10 = pnand %p1755_p9, %p1752_p8 }
  0x19   :  { %1760 = shalt.err (!%p1757_p10)
}
  0x1a   :  { %s1761_s4 = scalar_lea.vmem %s28_s24, 512  ;;  %p1766_p12 = scmp.lt.s32.totalorder %s28_s24, %s28_s24 }
  0x1b   :  { %p1762_p11 = scmp.ne.s32.totalorder %s28_s24, %s1761_s4  ;;  %p1767_p13 = scmp.lt.s32.totalorder %s1761_s4, %s1761_s4 }
  0x1d   :  { %p1768_p0 = por %p1767_p13, %p1766_p12 }
  0x1f   :  { %p1769_p1 = pnand %p1768_p0, %p1762_p11 }
  0x21   :  { %1772 = shalt.err (!%p1769_p1)
}
  0x22   :  { %33 = dma.hbm_to_vmem [thread:$0]  %s2038_s1, 512, %s28_s24, [#allocation6], %s1802_s19, %s1802_s19, %s1803_s20  }
  0x23   :  { %1795 = dma.done.wait [#allocation3], 256  }
  0x24   :  { %1796 = vsyncadd [#allocation3], 4294967040 }
  0x25   :  { %1797 = dma.done.wait [#allocation6], 512  }
  0x26   :  { %1798 = vsyncadd [#allocation6], 4294966784  ;;  %vm46_vm0 = vcmask 261120   ;;  %v42_v0 = vld [vmem:[#allocation5] sm:$0xff]  ;;  %v43_v1 = vld [vmem:[#allocation5 + $0x8] sm:$0xff]  ;;  %v1805_v8 = vmov 0.0   ;;  %v128_v13 = vlaneseq }
  0x27   :  { %v44_v2 = vld [vmem:[#allocation5 + $0x10] sm:$0xff]  ;;  %v1669_v3 = vpack.c.bf16 %v43_v1, %v42_v0  ;;  %v45_v4 = vld [vmem:[#allocation5 + $0x18] sm:$0xff]  ;;  %1589 = vmatprep.subr.mxu1 %v1805_v8  ;;  %vm1806_vm1 = vmmov 0   ;;  %s1807_s1 = smov 96   ;;  %vm136_vm2 = vcmask 64512   ;;  %s1808_s6 = smov 64  }
  0x28   :  { %v40_v5 = vld [vmem:[#allocation2] sm:$0xff]  ;;  %v1673_v6 = vpack.c.bf16 %v45_v4, %v44_v2  ;;  %v41_v7 = vld [vmem:[#allocation2 + $0x8] sm:$0xff]  ;;  %1591 = vmatprep.mubr.msk.f32.mxu1 %vm1806_vm1, %v1805_v8  ;;  %v129_v14 = vshrl.u32 %v128_v13, 7  ;;  %v131_v15 = vand.u32 127, %v128_v13  ;;  %s1809_s7 = smov 88   ;;  %s1810_s8 = smov 120  }
  0x29   :  { %1586 = vmatprep.mubr.msk.f32.mxu0 %vm46_vm0, %v40_v5  ;;  %1670 = vmatprep.subr.bf16.mxu0 %v1669_v3  ;;  %s1811_s9 = smov 56   ;;  %s1812_s10 = smov 80   ;;  %vm1491_vm4 = vcmask 195584   ;;  %vm1488_vm5 = vcmask 130048  }
  0x2a   :  { %1672 = vmatpush3.bf16.msra.mxu0 %v1669_v3  ;;  %vm1892_vm3 = vcmp.ge.s32.totalorder %v129_v14, %v131_v15  ;;  %s1813_s11 = smov 112   ;;  %s1814_s12 = smov 48  }
  0x2b   :  { %1674 = vmatprep.subr.bf16.mxu0 %v1673_v6  ;;  %s1815_s13 = smov 72   ;;  %s1816_s14 = smov 104  }
  0x2c   :  { %s1817_s15 = smov 40   ;;  %s1818_s16 = smov 16  }
  0x2d   :  { %s1819_s17 = smov 24   ;;  %s1820_s18 = smov [#allocation7]  }
  0x2e   :  { %1676 = vmatpush3.bf16.msra.mxu0 %v1673_v6  ;;  %s1501_s21 = sshll.u32 %s1820_s18, 4  ;;  %s1502_s21 = int_to_ptr.vmem [resolvable:$true] %s1501_s21 }
  0x2f   :  { %1599 = vmatprep.subr.mxu0 %v1805_v8  ;;  %s1773_s22 = scalar_lea.vmem %s1502_s21, 256  ;;  %p1778_p3 = scmp.lt.s32.totalorder %s1502_s21, %s1502_s21 }
  0x30   :  { %p1774_p2 = scmp.ne.s32.totalorder %s1502_s21, %s1773_s22  ;;  %p1779_p4 = scmp.lt.s32.totalorder %s1773_s22, %s1773_s22 }
  0x31   :  { %1587 = vmatmul.mubr.msk.f32.vlgmr.msra.gmra.mrb[0].mxu0 %vm46_vm0, %v41_v7 }
  0x32   :  { %1601 = vmatprep.mubr.msk.f32.mxu0 %vm1806_vm1, %v1805_v8  ;;  %p1780_p5 = por %p1779_p4, %p1778_p3 }
  0x34   :  { %p1781_p6 = pnand %p1780_p5, %p1774_p2 }
 0x104   :  { %v1874_v9 = vpop.f32.mrb[0].mxu0 }
 0x105   :  { %v1876_v10 = vpop.f32.mrb[1].mxu0 }
 0x106   :  { %134 = vrot.lane.b32.xlu0 %v1876_v10, %s1807_s1 }
 0x10a   :  { %212 = vrot.lane.b32.xlu0 %v1874_v9, %s1807_s1 }
 0x178   :  { %v135_v11 = vpop.permute.xlu0 %134 }
 0x179   :  { %1590 = vmatpush3.xpose.msk.msra.mxu1 %vm136_vm2, %v135_v11 }
 0x17a   :  { %1594 = vmatprep.subr.mxu1 %v1805_v8 }
 0x17c   :  { %1592 = vmatmul.mubr.msk.f32.vlgmr.msra.gmra.mrb[0].mxu1 %vm136_vm2, %v1876_v10  ;;  %v213_v12 = vpop.permute.xlu0 %212 }
 0x17d   :  { %1595 = vmatpush3.xpose.msk.msra.mxu1 %vm136_vm2, %v213_v12  ;;  %1596 = vmatprep.mubr.msk.f32.mxu1 %vm1806_vm1, %v1805_v8 }
 0x17e   :  { %1604 = vmatprep.subr.mxu1 %v1805_v8 }
 0x180   :  { %1597 = vmatmul.mubr.msk.f32.vlgmr.msra.gmra.mrb[2].mxu1 %vm136_vm2, %v1874_v9 }
 0x181   :  { %1606 = vmatprep.mubr.msk.f32.mxu1 %vm1806_vm1, %v1805_v8 }
 0x24f   :  { %v207_v17 = vpop.f32.mrb[0].mxu1 }
 0x250   :  { %v290_v18 = vsel %vm1892_vm3, %v207_v17, -inf  ;;  %v1593_v19 = vpop.f32.mrb[1].mxu1 }
 0x251   :  { %v292_v20 = vsel %vm136_vm2, %v290_v18, -inf }
 0x252   :  { %293 = vmax.xlane.f32.xlu1 %v292_v20 }
 0x253   :  { %v284_v21 = vpop.f32.mrb[2].mxu1 }
 0x254   :  { %v291_v22 = vsel %vm1892_vm3, %v284_v21, -inf  ;;  %v1598_v23 = vpop.f32.mrb[3].mxu1 }
 0x255   :  { %v295_v24 = vsel %vm136_vm2, %v291_v22, -inf }
 0x256   :  { %296 = vmax.xlane.f32.xlu1 %v295_v24 }
 0x267   :  { %314 = vrot.lane.b32.xlu1 %v1876_v10, %s1808_s6 }
 0x26b   :  { %390 = vrot.lane.b32.xlu1 %v1874_v9, %s1808_s6 }
 0x26f   :  { %468 = vrot.lane.b32.xlu1 %v1876_v10, %s1809_s7 }
 0x273   :  { %546 = vrot.lane.b32.xlu1 %v1874_v9, %s1809_s7 }
 0x2df   :  { %v294_v25 = vpop.xlane.xlu1 %293 }
 0x2e0   :  { %v298_v26 = vsub.f32 %v290_v18, %v294_v25 }
 0x2e2   :  { %v300_v27 = vmul.f32 1.442695, %v298_v26 }
 0x2e3   :  { %v297_v28 = vpop.xlane.xlu1 %296 }
 0x2e4   :  { %1697 = vpow2.f32 %v300_v27  ;;  %v299_v29 = vsub.f32 %v291_v22, %v297_v28 }
 0x2e6   :  { %v302_v30 = vmul.f32 1.442695, %v299_v29 }
 0x2e7   :  { %v315_v31 = vpop.permute.xlu1 %314 }
 0x2e8   :  { %1699 = vpow2.f32 %v302_v30  ;;  %1600 = vmatpush3.msra.mxu0 %v315_v31 }
 0x2e9   :  { %1609 = vmatprep.subr.mxu0 %v1805_v8 }
 0x2eb   :  { %v391_v32 = vpop.permute.xlu1 %390 }
 0x2ec   :  { %1605 = vmatpush3.msra.mxu1 %v391_v32 }
 0x2ed   :  { %1614 = vmatprep.subr.mxu1 %v1805_v8 }
 0x2ee   :  { %v1698_v33 = vpop.eup %1697 }
 0x2ef   :  { %v304_v34 = vsel %vm136_vm2, %v1698_v33, 0.0  ;;  %v469_v37 = vpop.permute.xlu1 %468 }
 0x2f0   :  { %305 = vadd.xlane.f32.xlu0 %v304_v34 }
 0x2f2   :  { %v1700_v35 = vpop.eup %1699 }
 0x2f3   :  { %v307_v36 = vsel %vm136_vm2, %v1700_v35, 0.0  ;;  %v547_v38 = vpop.permute.xlu1 %546 }
 0x2f4   :  { %308 = vadd.xlane.f32.xlu1 %v307_v36 }
 0x305   :  { %544 = vrot.lane.b32.xlu1 %v1874_v9, %s1810_s8 }
 0x306   :  { %466 = vrot.lane.b32.xlu0 %v1876_v10, %s1810_s8 }
 0x37d   :  { %v306_v39 = vpop.xlane.xlu0 %305 }
 0x37e   :  { %1701 = vrcp.f32 %v306_v39 }
 0x381   :  { %v309_v40 = vpop.xlane.xlu1 %308  ;;  %v467_v45 = vpop.permute.xlu0 %466 }
 0x382   :  { %1703 = vrcp.f32 %v309_v40 }
 0x385   :  { %v545_v46 = vpop.permute.xlu1 %544 }
 0x388   :  { %v1702_v41 = vpop.eup %1701 }
 0x389   :  { %v312_v42 = vmul.f32 %v1702_v41, %v1698_v33 }
 0x38b   :  { %1602 = vmatmul.mubr.msk.f32.vlgmr.msra.gmra.mrb[2].mxu0 %vm136_vm2, %v312_v42 }
 0x38c   :  { %v1704_v43 = vpop.eup %1703  ;;  %1610 = vmatpush3.xpose.msk.msra.mxu0 %vm136_vm2, %v469_v37  ;;  %1611 = vmatprep.mubr.msk.f32.mxu0 %vm1806_vm1, %v1805_v8 }
 0x38d   :  { %v313_v44 = vmul.f32 %v1704_v43, %v1700_v35  ;;  %1619 = vmatprep.subr.mxu0 %v1805_v8 }
 0x38f   :  { %1607 = vmatmul.mubr.msk.f32.vlgmr.msra.gmra.mrb[4].mxu1 %vm136_vm2, %v313_v44  ;;  %1612 = vmatmul.mubr.msk.f32.vlgmr.msra.gmra.mrb[4].mxu0 %vm136_vm2, %v467_v45 }
 0x390   :  { %1615 = vmatpush3.xpose.msk.msra.mxu1 %vm136_vm2, %v547_v38  ;;  %1616 = vmatprep.mubr.msk.f32.mxu1 %vm1806_vm1, %v1805_v8 }
 0x391   :  { %1624 = vmatprep.subr.mxu1 %v1805_v8  ;;  %1621 = vmatprep.mubr.msk.f32.mxu0 %vm1806_vm1, %v1805_v8 }
 0x393   :  { %1617 = vmatmul.mubr.msk.f32.vlgmr.msra.gmra.mrb[6].mxu1 %vm136_vm2, %v545_v46 }
 0x394   :  { %1626 = vmatprep.mubr.msk.f32.mxu1 %vm1806_vm1, %v1805_v8 }
 0x45e   :  { %v1928_v47 = vpop.f32.mrb[2].mxu0 }
 0x45f   :  { %v1603_v48 = vpop.f32.mrb[3].mxu0 }
 0x462   :  { %v1930_v49 = vpop.f32.mrb[4].mxu1  ;;  %v540_v50 = vpop.f32.mrb[4].mxu0 }
 0x463   :  { %v622_v51 = vsel %vm1892_vm3, %v540_v50, -inf  ;;  %v1608_v52 = vpop.f32.mrb[5].mxu1  ;;  %v1613_v53 = vpop.f32.mrb[5].mxu0 }
 0x464   :  { %v624_v54 = vsel %vm136_vm2, %v622_v51, -inf }
 0x465   :  { %625 = vmax.xlane.f32.xlu1 %v624_v54 }
 0x466   :  { %v618_v55 = vpop.f32.mrb[6].mxu1 }
 0x467   :  { %v623_v56 = vsel %vm1892_vm3, %v618_v55, -inf  ;;  %v1618_v57 = vpop.f32.mrb[7].mxu1 }
 0x468   :  { %v627_v58 = vsel %vm136_vm2, %v623_v56, -inf }
 0x469   :  { %628 = vmax.xlane.f32.xlu0 %v627_v58 }
 0x476   :  { %646 = vrot.lane.b32.xlu1 %v1876_v10, %s1811_s9 }
 0x47a   :  { %800 = vrot.lane.b32.xlu1 %v1876_v10, %s1812_s10 }
 0x47e   :  { %878 = vrot.lane.b32.xlu1 %v1874_v9, %s1812_s10 }
 0x47f   :  { %722 = vrot.lane.b32.xlu0 %v1874_v9, %s1811_s9 }
 0x483   :  { %798 = vrot.lane.b32.xlu0 %v1876_v10, %s1813_s11 }
 0x4f2   :  { %v626_v59 = vpop.xlane.xlu1 %625 }
 0x4f3   :  { %v630_v60 = vsub.f32 %v622_v51, %v626_v59 }
 0x4f5   :  { %v632_v61 = vmul.f32 1.442695, %v630_v60 }
 0x4f6   :  { %v647_v62 = vpop.permute.xlu1 %646  ;;  %v629_v63 = vpop.xlane.xlu0 %628 }
 0x4f7   :  { %1705 = vpow2.f32 %v632_v61  ;;  %v631_v0 = vsub.f32 %v623_v56, %v629_v63  ;;  %1620 = vmatpush3.msra.mxu0 %v647_v62 }
 0x4f8   :  { %1629 = vmatprep.subr.mxu0 %v1805_v8 }
 0x4f9   :  { %v634_v1 = vmul.f32 1.442695, %v631_v0 }
 0x4fa   :  { %v723_v2 = vpop.permute.xlu0 %722  ;;  %v801_v7 = vpop.permute.xlu1 %800 }
 0x4fb   :  { %1707 = vpow2.f32 %v634_v1  ;;  %1625 = vmatpush3.msra.mxu1 %v723_v2 }
 0x4fc   :  { %1634 = vmatprep.subr.mxu1 %v1805_v8 }
 0x4fe   :  { %v879_v11 = vpop.permute.xlu1 %878  ;;  %v799_v19 = vpop.permute.xlu0 %798 }
 0x501   :  { %v1706_v3 = vpop.eup %1705 }
 0x502   :  { %v636_v4 = vsel %vm136_vm2, %v1706_v3, 0.0 }
 0x503   :  { %637 = vadd.xlane.f32.xlu1 %v636_v4 }
 0x505   :  { %v1708_v5 = vpop.eup %1707 }
 0x506   :  { %v639_v6 = vsel %vm136_vm2, %v1708_v5, 0.0 }
 0x507   :  { %640 = vadd.xlane.f32.xlu1 %v639_v6 }
 0x518   :  { %876 = vrot.lane.b32.xlu1 %v1874_v9, %s1813_s11 }
 0x590   :  { %v638_v12 = vpop.xlane.xlu1 %637 }
 0x591   :  { %1709 = vrcp.f32 %v638_v12 }
 0x594   :  { %v641_v13 = vpop.xlane.xlu1 %640 }
 0x595   :  { %1711 = vrcp.f32 %v641_v13 }
 0x598   :  { %v877_v20 = vpop.permute.xlu1 %876 }
 0x59b   :  { %v1710_v14 = vpop.eup %1709 }
 0x59c   :  { %v644_v15 = vmul.f32 %v1710_v14, %v1706_v3 }
 0x59e   :  { %1622 = vmatmul.mubr.msk.f32.vlgmr.msra.gmra.mrb[6].mxu0 %vm136_vm2, %v644_v15 }
 0x59f   :  { %v1712_v17 = vpop.eup %1711  ;;  %1630 = vmatpush3.xpose.msk.msra.mxu0 %vm136_vm2, %v801_v7  ;;  %1631 = vmatprep.mubr.msk.f32.mxu0 %vm1806_vm1, %v1805_v8 }
 0x5a0   :  { %v645_v18 = vmul.f32 %v1712_v17, %v1708_v5  ;;  %1639 = vmatprep.subr.mxu0 %v1805_v8 }
 0x5a2   :  { %1627 = vmatmul.mubr.msk.f32.vlgmr.msra.gmra.mrb[8].mxu1 %vm136_vm2, %v645_v18  ;;  %1632 = vmatmul.mubr.msk.f32.vlgmr.msra.gmra.mrb[8].mxu0 %vm136_vm2, %v799_v19 }
 0x5a3   :  { %1635 = vmatpush3.xpose.msk.msra.mxu1 %vm136_vm2, %v879_v11  ;;  %1636 = vmatprep.mubr.msk.f32.mxu1 %vm1806_vm1, %v1805_v8 }
 0x5a4   :  { %1644 = vmatprep.subr.mxu1 %v1805_v8  ;;  %1641 = vmatprep.mubr.msk.f32.mxu0 %vm1806_vm1, %v1805_v8 }
 0x5a6   :  { %1637 = vmatmul.mubr.msk.f32.vlgmr.msra.gmra.mrb[10].mxu1 %vm136_vm2, %v877_v20 }
 0x5a7   :  { %1646 = vmatprep.mubr.msk.f32.mxu1 %vm1806_vm1, %v1805_v8 }
 0x671   :  { %v1964_v21 = vpop.f32.mrb[6].mxu0 }
 0x672   :  { %v1623_v22 = vpop.f32.mrb[7].mxu0 }
 0x675   :  { %v1966_v23 = vpop.f32.mrb[8].mxu1  ;;  %v872_v24 = vpop.f32.mrb[8].mxu0 }
 0x676   :  { %v954_v25 = vsel %vm1892_vm3, %v872_v24, -inf  ;;  %v1628_v26 = vpop.f32.mrb[9].mxu1  ;;  %v1633_v27 = vpop.f32.mrb[9].mxu0 }
 0x677   :  { %v956_v28 = vsel %vm136_vm2, %v954_v25, -inf }
 0x678   :  { %957 = vmax.xlane.f32.xlu0 %v956_v28 }
 0x679   :  { %v950_v29 = vpop.f32.mrb[10].mxu1 }
 0x67a   :  { %v955_v30 = vsel %vm1892_vm3, %v950_v29, -inf  ;;  %v1638_v31 = vpop.f32.mrb[11].mxu1 }
 0x67b   :  { %v959_v32 = vsel %vm136_vm2, %v955_v30, -inf }
 0x67c   :  { %960 = vmax.xlane.f32.xlu1 %v959_v32 }
 0x68d   :  { %978 = vrot.lane.b32.xlu1 %v1876_v10, %s1814_s12 }
 0x68e   :  { %1054 = vrot.lane.b32.xlu0 %v1874_v9, %s1814_s12 }
 0x691   :  { %1132 = vrot.lane.b32.xlu1 %v1876_v10, %s1815_s13 }
 0x695   :  { %1210 = vrot.lane.b32.xlu1 %v1874_v9, %s1815_s13 }
 0x699   :  { %1208 = vrot.lane.b32.xlu1 %v1874_v9, %s1816_s14 }
 0x705   :  { %v958_v33 = vpop.xlane.xlu0 %957 }
 0x706   :  { %v962_v34 = vsub.f32 %v954_v25, %v958_v33 }
 0x708   :  { %v964_v35 = vmul.f32 1.442695, %v962_v34 }
 0x709   :  { %v961_v36 = vpop.xlane.xlu1 %960  ;;  %v1055_v37 = vpop.permute.xlu0 %1054 }
 0x70a   :  { %1713 = vpow2.f32 %v964_v35  ;;  %v963_v38 = vsub.f32 %v955_v30, %v961_v36  ;;  %1645 = vmatpush3.msra.mxu1 %v1055_v37 }
 0x70b   :  { %1654 = vmatprep.subr.mxu1 %v1805_v8 }
 0x70c   :  { %v966_v39 = vmul.f32 1.442695, %v963_v38 }
 0x70d   :  { %v979_v40 = vpop.permute.xlu1 %978 }
 0x70e   :  { %1715 = vpow2.f32 %v966_v39  ;;  %1640 = vmatpush3.msra.mxu0 %v979_v40 }
 0x70f   :  { %1649 = vmatprep.subr.mxu0 %v1805_v8 }
 0x711   :  { %v1133_v48 = vpop.permute.xlu1 %1132 }
 0x714   :  { %v1714_v41 = vpop.eup %1713 }
 0x715   :  { %v968_v42 = vsel %vm136_vm2, %v1714_v41, 0.0  ;;  %v1211_v53 = vpop.permute.xlu1 %1210 }
 0x716   :  { %969 = vadd.xlane.f32.xlu0 %v968_v42 }
 0x718   :  { %v1716_v43 = vpop.eup %1715 }
 0x719   :  { %v971_v44 = vsel %vm136_vm2, %v1716_v43, 0.0  ;;  %v1209_v56 = vpop.permute.xlu1 %1208 }
 0x71a   :  { %972 = vadd.xlane.f32.xlu0 %v971_v44 }
 0x730   :  { %1130 = vrot.lane.b32.xlu0 %v1876_v10, %s1816_s14 }
 0x7a3   :  { %v970_v45 = vpop.xlane.xlu0 %969 }
 0x7a4   :  { %1717 = vrcp.f32 %v970_v45 }
 0x7a7   :  { %v973_v46 = vpop.xlane.xlu0 %972 }
 0x7a8   :  { %1719 = vrcp.f32 %v973_v46 }
 0x7ab   :  { %v1131_v55 = vpop.permute.xlu0 %1130 }
 0x7ae   :  { %v1718_v50 = vpop.eup %1717 }
 0x7af   :  { %v976_v51 = vmul.f32 %v1718_v50, %v1714_v41 }
 0x7b1   :  { %1642 = vmatmul.mubr.msk.f32.vlgmr.msra.gmra.mrb[10].mxu0 %vm136_vm2, %v976_v51 }
 0x7b2   :  { %v1720_v52 = vpop.eup %1719  ;;  %1650 = vmatpush3.xpose.msk.msra.mxu0 %vm136_vm2, %v1133_v48  ;;  %1651 = vmatprep.mubr.msk.f32.mxu0 %vm1806_vm1, %v1805_v8 }
 0x7b3   :  { %v977_v54 = vmul.f32 %v1720_v52, %v1716_v43  ;;  %1659 = vmatprep.subr.mxu0 %v1805_v8 }
 0x7b5   :  { %1647 = vmatmul.mubr.msk.f32.vlgmr.msra.gmra.mrb[12].mxu1 %vm136_vm2, %v977_v54  ;;  %1652 = vmatmul.mubr.msk.f32.vlgmr.msra.gmra.mrb[12].mxu0 %vm136_vm2, %v1131_v55 }
 0x7b6   :  { %1655 = vmatpush3.xpose.msk.msra.mxu1 %vm136_vm2, %v1211_v53  ;;  %1656 = vmatprep.mubr.msk.f32.mxu1 %vm1806_vm1, %v1805_v8 }
 0x7b7   :  { %1664 = vmatprep.subr.mxu1 %v1805_v8  ;;  %1661 = vmatprep.mubr.msk.f32.mxu0 %vm1806_vm1, %v1805_v8 }
 0x7b9   :  { %1657 = vmatmul.mubr.msk.f32.vlgmr.msra.gmra.mrb[14].mxu1 %vm136_vm2, %v1209_v56 }
 0x7ba   :  { %1666 = vmatprep.mubr.msk.f32.mxu1 %vm1806_vm1, %v1805_v8 }
 0x884   :  { %v1050_v57 = vpop.f32.mrb[10].mxu0 }
 0x885   :  { %v1643_v58 = vpop.f32.mrb[11].mxu0 }
 0x888   :  { %v1126_v59 = vpop.f32.mrb[12].mxu1  ;;  %v1204_v60 = vpop.f32.mrb[12].mxu0 }
 0x889   :  { %v1286_v61 = vsel %vm1892_vm3, %v1204_v60, -inf  ;;  %v1648_v62 = vpop.f32.mrb[13].mxu1  ;;  %v1653_v63 = vpop.f32.mrb[13].mxu0 }
 0x88a   :  { %v1288_v0 = vsel %vm136_vm2, %v1286_v61, -inf }
 0x88b   :  { %1289 = vmax.xlane.f32.xlu0 %v1288_v0 }
 0x88c   :  { %v1282_v1 = vpop.f32.mrb[14].mxu1 }
 0x88d   :  { %v1287_v2 = vsel %vm1892_vm3, %v1282_v1, -inf  ;;  %v1658_v3 = vpop.f32.mrb[15].mxu1 }
 0x88e   :  { %v1291_v4 = vsel %vm136_vm2, %v1287_v2, -inf }
 0x88f   :  { %1292 = vmax.xlane.f32.xlu1 %v1291_v4 }
 0x8a0   :  { %1310 = vrot.lane.b32.xlu1 %v1876_v10, %s1817_s15 }
 0x8a4   :  { %1464 = vrot.lane.b32.xlu1 %v1964_v21, %s1803_s20 }
 0x8a8   :  { %1466 = vrot.lane.b32.xlu1 %v1966_v23, %s1803_s20 }
 0x8ac   :  { %1474 = vrot.lane.b32.xlu1 %v1126_v59, %s1818_s16 }
 0x918   :  { %v1290_v8 = vpop.xlane.xlu0 %1289 }
 0x919   :  { %v1294_v5 = vsub.f32 %v1286_v61, %v1290_v8 }
 0x91b   :  { %v1296_v6 = vmul.f32 1.442695, %v1294_v5 }
 0x91c   :  { %v1293_v16 = vpop.xlane.xlu1 %1292 }
 0x91d   :  { %1721 = vpow2.f32 %v1296_v6  ;;  %v1295_v7 = vsub.f32 %v1287_v2, %v1293_v16 }
 0x91f   :  { %v1298_v11 = vmul.f32 1.442695, %v1295_v7 }
 0x920   :  { %v1311_v12 = vpop.permute.xlu1 %1310 }
 0x921   :  { %1723 = vpow2.f32 %v1298_v11  ;;  %1660 = vmatpush3.msra.mxu0 %v1311_v12 }
 0x924   :  { %v1465_v27 = vpop.permute.xlu1 %1464 }
 0x925   :  { %v1486_v30 = vsel %vm136_vm2, %v1928_v47, %v1465_v27 }
 0x927   :  { %v1722_v13 = vpop.eup %1721 }
 0x928   :  { %v1300_v10 = vsel %vm136_vm2, %v1722_v13, 0.0  ;;  %v1467_v28 = vpop.permute.xlu1 %1466 }
 0x929   :  { %1301 = vadd.xlane.f32.xlu0 %v1300_v10  ;;  %v1487_v35 = vsel %vm136_vm2, %v1930_v49, %v1467_v28 }
 0x92b   :  { %v1724_v14 = vpop.eup %1723 }
 0x92c   :  { %v1303_v15 = vsel %vm136_vm2, %v1724_v14, 0.0  ;;  %v1475_v31 = vpop.permute.xlu1 %1474 }
 0x92d   :  { %1304 = vadd.xlane.f32.xlu0 %v1303_v15  ;;  %v1490_v36 = vsel %vm1488_vm5, %v1487_v35, %v1475_v31 }
 0x943   :  { %1386 = vrot.lane.b32.xlu0 %v1874_v9, %s1817_s15 }
 0x947   :  { %1472 = vrot.lane.b32.xlu0 %v1050_v57, %s1818_s16 }
 0x9b6   :  { %v1302_v17 = vpop.xlane.xlu0 %1301 }
 0x9b7   :  { %1725 = vrcp.f32 %v1302_v17 }
 0x9ba   :  { %v1305_v18 = vpop.xlane.xlu0 %1304 }
 0x9bb   :  { %1727 = vrcp.f32 %v1305_v18 }
 0x9be   :  { %v1387_v19 = vpop.permute.xlu0 %1386 }
 0x9bf   :  { %1665 = vmatpush3.msra.mxu1 %v1387_v19 }
 0x9c1   :  { %v1726_v20 = vpop.eup %1725 }
 0x9c2   :  { %v1308_v21 = vmul.f32 %v1726_v20, %v1722_v13  ;;  %v1473_v29 = vpop.permute.xlu0 %1472 }
 0x9c3   :  { %v1489_v32 = vsel %vm1488_vm5, %v1486_v30, %v1473_v29 }
 0x9c4   :  { %1662 = vmatmul.mubr.msk.f32.vlgmr.msra.gmra.mrb[14].mxu0 %vm136_vm2, %v1308_v21 }
 0x9c5   :  { %v1728_v22 = vpop.eup %1727 }
 0x9c6   :  { %v1309_v23 = vmul.f32 %v1728_v22, %v1724_v14 }
 0x9c8   :  { %1667 = vmatmul.mubr.msk.f32.vlgmr.msra.gmra.mrb[16].mxu1 %vm136_vm2, %v1309_v23 }
 0xa97   :  { %v1382_v24 = vpop.f32.mrb[14].mxu0 }
 0xa98   :  { %1480 = vrot.lane.b32.xlu0 %v1382_v24, %s1819_s17  ;;  %v1663_v25 = vpop.f32.mrb[15].mxu0 }
 0xa9b   :  { %v1458_v9 = vpop.f32.mrb[16].mxu1 }
 0xa9c   :  { %1482 = vrot.lane.b32.xlu1 %v1458_v9, %s1819_s17  ;;  %v1668_v26 = vpop.f32.mrb[17].mxu1 }
 0xb0a   :  { %v1481_v33 = vpop.permute.xlu0 %1480 }
 0xb0b   :  { %v1492_v34 = vsel %vm1491_vm4, %v1489_v32, %v1481_v33 }
 0xb0c   :  { %1494 = vst.msk [vmem:[#allocation7] sm:$0xff] %vm46_vm0, %v1492_v34 }
 0xb0e   :  { %v1483_v37 = vpop.permute.xlu1 %1482 }
 0xb0f   :  { %v1493_v38 = vsel %vm1491_vm4, %v1490_v36, %v1483_v37 }
 0xb10   :  { %1495 = vst.msk [vmem:[#allocation7 + $0x8] sm:$0xff] %vm46_vm0, %v1493_v38 }
 0xb11   :  { %1784 = shalt.err (!%p1781_p6)
}
 0xb12   :  { %s1785_s25 = scalar_lea.hbm %s2039_s2, 256 }
 0xb13   :  { %p1786_p7 = scmp.ne.s32.totalorder %s2039_s2, %s1785_s25  ;;  %p1789_p8 = scmp.lt.u32.totalorder %s1785_s25, %s2039_s2 }
 0xb15   :  { %p1791_p9 = pnand %p1789_p8, %p1786_p7 }
 0xb17   :  { %1794 = shalt.err (!%p1791_p9)
}
 0xb18   :  { %1507 = dma.vmem_to_hbm [thread:$0]  %s1502_s21, 256, %s2039_s2, [#allocation4], %s1802_s19, %s1802_s19, %s1803_s20  }
 0xb19   :  { %1799 = dma.done.wait [#allocation4], 256  }
 0xb1a   :  { %1800 = vsyncadd [#allocation4], 4294967040 }
 0xb1b   :  { %1511 = vsyncpa [#allocation3], 1 }
 0xb1c   :  { %1512 = vsyncpa [#allocation6], 1 }
 0xb1d   :  { %1513 = vsyncpa [#allocation4], 1 }

</bundles_post_ra>
